<compile_context>
chip_gen: v7x
topology: tpu7x:2x2x1
jax: 0.10.0
libtpu: 0.0.40
codegen_flags: <defaults>
</compile_context>

<pallas_src>
import functools
import math

import jax
import jax.numpy as jnp
import numpy as np
from jax.experimental import pallas as pl
from jax.experimental.pallas import tpu as pltpu


# ----------------------------------------------------------------------------
# ALiBi bias construction exactly mirroring Alibi._create_M (numpy, used only
# by the pure-JAX reference to validate the in-kernel iota-based bias).
# ----------------------------------------------------------------------------
def create_alibi_M(context_x, context_y, n_heads):
    if context_y is None:
        context_y = context_x
    x_longer = context_x > context_y
    n_seq = np.arange(n_heads, 0, -1).astype(np.float64)
    head_scalars = 2.0 ** (-8.0 / n_seq)                       # (H,)
    if x_longer:
        lower_len, diff, axis = context_y, context_x - context_y, 1
    else:
        lower_len, diff, axis = context_x, context_y - context_x, 0
    idx = np.arange(lower_len)
    M = -np.abs(idx[:, None] - idx[None, :]).astype(np.float64)  # (L, L)
    if diff > 0:
        for d in range(diff):
            vec = np.arange(-lower_len - d, -d, dtype=np.float64)
            M = np.concatenate((M, np.expand_dims(vec, axis)), axis=axis)
    M = M[None, :, :] * head_scalars[:, None, None]
    M = np.transpose(M, (0, 2, 1))                             # (H, cx, cy)
    return M.astype(np.float32)


# ----------------------------------------------------------------------------
# Fused attention kernel (one batch element per grid step).
#   x_ref      : (N, D)        f32   (batch dim squeezed by BlockSpec)
#   gamma/beta : (1, D)        f32
#   wqkv_ref   : (3H, D, dh)   bf16  head-major packed [Wq_h*scale|Wk_h|Wv_h]
#   wo_ref     : (H, dh, D)    bf16  head-major W_o
#   slopes_ref : (H, 1, 1)     f32   ALiBi per-head slopes
#   o_ref      : (N, D)        f32
# ----------------------------------------------------------------------------
def attention_kernel(x_ref, gamma_ref, beta_ref, wqkv_ref, wo_ref, slopes_ref,
                     o_ref, *, n_heads, dim_head, eps):
    x = x_ref[...]                                  # (N, D) f32
    n, d = x.shape
    h, dh = n_heads, dim_head

    # --- LayerNorm over features (biased variance, matches torch) ---------
    mean = jnp.mean(x, axis=-1, keepdims=True)
    var = jnp.mean((x - mean) ** 2, axis=-1, keepdims=True)
    xn = (x - mean) * jax.lax.rsqrt(var + eps)
    xn = xn * gamma_ref[...] + beta_ref[...]        # (1,D) broadcasts

    # --- fused head-major Q/K/V projection (single batched MXU op) --------
    xn_b = jnp.broadcast_to(xn.astype(jnp.bfloat16)[None], (3 * h, n, d))
    qkv = jnp.einsum('hnd,hde->hne', xn_b, wqkv_ref[...],
                     preferred_element_type=jnp.float32)   # (3H, N, dh) f32

    q = qkv[:h].astype(jnp.bfloat16)                # 1/sqrt(dh) pre-folded
    k = qkv[h:2 * h].astype(jnp.bfloat16)
    v = qkv[2 * h:].astype(jnp.bfloat16)

    # --- scores (contract last dims, batched over heads) + in-kernel ALiBi
    s = jnp.einsum('hnd,hmd->hnm', q, k,
                   preferred_element_type=jnp.float32)     # (H, N, N) f32
    ii = jax.lax.broadcasted_iota(jnp.int32, (n, n), 0)
    jj = jax.lax.broadcasted_iota(jnp.int32, (n, n), 1)
    dist = (-jnp.abs(ii - jj)).astype(jnp.float32)          # (N, N)
    s = s + slopes_ref[...] * dist[None]                    # (H,1,1)*(1,N,N)

    # --- softmax: f32, max-stabilized, EUP reciprocal instead of divide ---
    s = s - jnp.max(s, axis=-1, keepdims=True)
    p = jnp.exp(s)
    denom = jnp.sum(p, axis=-1, keepdims=True)
    p = p * pl.reciprocal(denom, approx=True)

    # --- attention @ V and output projection (batched, then head-sum) -----
    o = jnp.einsum('hnm,hmd->hnd', p.astype(jnp.bfloat16), v,
                   preferred_element_type=jnp.float32)     # (H, N, dh)
    # concat_h(o_h) @ W_o == sum_h o_h @ W_o[h] : one batched matmul + reduce
    out = jnp.einsum('hnd,hdf->hnf', o.astype(jnp.bfloat16), wo_ref[...],
                     preferred_element_type=jnp.float32)   # (H, N, D)
    o_ref[...] = jnp.sum(out, axis=0)                       # (N, D) f32


# ----------------------------------------------------------------------------
# Wrapper: one-time parameter re-packing + pallas_call.
# ----------------------------------------------------------------------------
def attention_forward(x, gamma, beta, wq, wk, wv, wo, n_heads, dim_head,
                      eps=1e-5):
    B, N, D = x.shape
    H, dh = n_heads, dim_head
    scale = 1.0 / math.sqrt(dh)

    # Head-major, bf16 weight packing (one-time parameter preprocessing).
    def to_heads(w):                                # (D, H*dh) -> (H, D, dh)
        return jnp.transpose(w.reshape(D, H, dh), (1, 0, 2))

    wqkv_h = jnp.concatenate(
        [to_heads(wq) * scale, to_heads(wk), to_heads(wv)], axis=0
    ).astype(jnp.bfloat16)                          # (3H, D, dh)
    wo_h = wo.reshape(H, dh, D).astype(jnp.bfloat16)  # (H, dh, D)

    # ALiBi per-head slopes: 2 ** (-8 / [H, H-1, ..., 1])
    slopes = (2.0 ** (-8.0 / jnp.arange(H, 0, -1, dtype=jnp.float32)))
    slopes = slopes.astype(jnp.float32).reshape(H, 1, 1)

    kernel = functools.partial(attention_kernel, n_heads=H, dim_head=dh,
                               eps=eps)
    return pl.pallas_call(
        kernel,
        out_shape=jax.ShapeDtypeStruct((B, N, D), jnp.float32),
        grid_spec=pltpu.PrefetchScalarGridSpec(
            num_scalar_prefetch=0,
            grid=(B,),
            in_specs=[
                pl.BlockSpec((pl.Squeezed(), N, D), lambda b: (b, 0, 0)),  # x
                pl.BlockSpec((1, D), lambda b: (0, 0)),                    # ln gamma
                pl.BlockSpec((1, D), lambda b: (0, 0)),                    # ln beta
                pl.BlockSpec((3 * H, D, dh), lambda b: (0, 0, 0)),         # W_qkv
                pl.BlockSpec((H, dh, D), lambda b: (0, 0, 0)),             # W_o
                pl.BlockSpec((H, 1, 1), lambda b: (0, 0, 0)),              # slopes
            ],
            out_specs=pl.BlockSpec((pl.Squeezed(), N, D), lambda b: (b, 0, 0)),
        ),
        compiler_params=pltpu.CompilerParams(
            dimension_semantics=("parallel",)),
    )(x, gamma, beta, wqkv_h, wo_h, slopes)


# ----------------------------------------------------------------------------
# Pure-JAX f32 reference (mirrors the torch forward; uses the torch-style
# ALiBi buffer construction to validate the in-kernel iota-based bias).
# ----------------------------------------------------------------------------
def attention_reference(x, gamma, beta, wq, wk, wv, wo, alibi_bias,
                        n_heads, dim_head):
    mean = jnp.mean(x, axis=-1, keepdims=True)
    var = jnp.mean((x - mean) ** 2, axis=-1, keepdims=True)
    xn = (x - mean) / jnp.sqrt(var + 1e-5) * gamma[0] + beta[0]
    q = xn @ wq
    k = xn @ wk
    v = xn @ wv
    B, N, _ = x.shape
    q = q.reshape(B, N, n_heads, dim_head).transpose(0, 2, 1, 3)
    k = k.reshape(B, N, n_heads, dim_head).transpose(0, 2, 1, 3)
    v = v.reshape(B, N, n_heads, dim_head).transpose(0, 2, 1, 3)
    s = jnp.einsum('bhik,bhjk->bhij', q, k) / (dim_head ** 0.5)
    s = s + alibi_bias[None]
    p = jax.nn.softmax(s, axis=-1)
    o = jnp.einsum('bhij,bhjk->bhik', p, v)
    o = o.transpose(0, 2, 1, 3).reshape(B, N, n_heads * dim_head)
    return o @ wo


if __name__ == "__main__":
    # Small shapes consistent with the module defaults.
    batch = 2
    seq = 16
    dim = 32
    dim_head = 16
    n_heads = 4
    context_x = 32          # ALiBi buffer context; cropped to (seq, seq)
    inner = dim_head * n_heads

    key = jax.random.PRNGKey(0)
    kx, kq, kk, kv, ko = jax.random.split(key, 5)

    x = jax.random.normal(kx, (batch, seq, dim), dtype=jnp.float32)

    # Deterministic parameter init (synthetic; not a checkpoint load).
    # Weights are (in_features, out_features) = transpose of torch Linear.
    wq = jax.random.normal(kq, (dim, inner), dtype=jnp.float32) * 0.05
    wk = jax.random.normal(kk, (dim, inner), dtype=jnp.float32) * 0.05
    wv = jax.random.normal(kv, (dim, inner), dtype=jnp.float32) * 0.05
    wo = jax.random.normal(ko, (inner, dim), dtype=jnp.float32) * 0.05
    gamma = jnp.ones((1, dim), dtype=jnp.float32)   # torch LayerNorm init
    beta = jnp.zeros((1, dim), dtype=jnp.float32)

    out = attention_forward(x, gamma, beta, wq, wk, wv, wo,
                            n_heads, dim_head)
    out = jax.block_until_ready(out)

    # Reference uses the exact Alibi buffer (cropped), f32 matmuls.
    M_full = create_alibi_M(context_x, None, n_heads)          # (H, cx, cx)
    alibi_bias = jnp.asarray(M_full[:, :seq, :seq])            # (H, N, N)
    ref = attention_reference(x, gamma, beta, wq, wk, wv, wo, alibi_bias,
                              n_heads, dim_head)

    # bf16 matmul inputs + approx reciprocal -> loosened tolerance vs f32 ref.
    np.testing.assert_allclose(np.asarray(out), np.asarray(ref),
                               rtol=2e-2, atol=2e-2)

    print("KERNEL_OK")
</pallas_src>

<mosaic_0001>
module attributes {stable_mosaic.version = 11 : i64} {
  func.func @attention_kernel(%arg0: i32, %arg1: memref<1x16x32xf32, #tpu.memory_space<vmem>>, %arg2: memref<1x32xf32, #tpu.memory_space<vmem>>, %arg3: memref<1x32xf32, #tpu.memory_space<vmem>>, %arg4: memref<12x32x16xbf16, #tpu.memory_space<vmem>>, %arg5: memref<4x16x32xbf16, #tpu.memory_space<vmem>>, %arg6: memref<4x1x1xf32, #tpu.memory_space<vmem>>, %arg7: memref<1x16x32xf32, #tpu.memory_space<vmem>>) attributes {dimension_semantics = [#tpu.dimension_semantics<parallel>], iteration_bounds = array<i64: 2>, scalar_prefetch = 0 : i64, scratch_operands = 0 : i64, tpu.core_type = #tpu.core_type<tc>, window_params = [{transform_indices = @transform_0, window_bounds = array<i64: 1, 16, 32>}, {pipeline_mode = #tpu.pipeline_mode<synchronous>, transform_indices = @transform_1, window_bounds = array<i64: 1, 32>}, {pipeline_mode = #tpu.pipeline_mode<synchronous>, transform_indices = @transform_2, window_bounds = array<i64: 1, 32>}, {pipeline_mode = #tpu.pipeline_mode<synchronous>, transform_indices = @transform_3, window_bounds = array<i64: 12, 32, 16>}, {pipeline_mode = #tpu.pipeline_mode<synchronous>, transform_indices = @transform_4, window_bounds = array<i64: 4, 16, 32>}, {pipeline_mode = #tpu.pipeline_mode<synchronous>, transform_indices = @transform_5, window_bounds = array<i64: 4, 1, 1>}, {transform_indices = @transform_6, window_bounds = array<i64: 1, 16, 32>}]} {
    %c0 = arith.constant 0 : index
    %c0_0 = arith.constant 0 : index
    %c0_1 = arith.constant 0 : index
    %0 = vector.load %arg1[%c0, %c0_0, %c0_1] : memref<1x16x32xf32, #tpu.memory_space<vmem>>, vector<1x16x32xf32>
    %1 = vector.shape_cast %0 : vector<1x16x32xf32> to vector<16x32xf32>
    %cst = arith.constant dense<0.000000e+00> : vector<16xf32>
    %2 = vector.multi_reduction <add>, %1, %cst [1] : vector<16x32xf32> to vector<16xf32>
    %3 = vector.shape_cast %2 : vector<16xf32> to vector<16x1xf32>
    %cst_2 = arith.constant 3.200000e+01 : f32
    %4 = vector.broadcast %cst_2 : f32 to vector<16x1xf32>
    %5 = arith.divf %3, %4 : vector<16x1xf32>
    %6 = vector.broadcast %5 : vector<16x1xf32> to vector<16x32xf32>
    %7 = arith.subf %1, %6 : vector<16x32xf32>
    %8 = arith.mulf %7, %7 : vector<16x32xf32>
    %cst_3 = arith.constant dense<0.000000e+00> : vector<16xf32>
    %9 = vector.multi_reduction <add>, %8, %cst_3 [1] : vector<16x32xf32> to vector<16xf32>
    %10 = vector.shape_cast %9 : vector<16xf32> to vector<16x1xf32>
    %cst_4 = arith.constant 3.200000e+01 : f32
    %11 = vector.broadcast %cst_4 : f32 to vector<16x1xf32>
    %12 = arith.divf %10, %11 : vector<16x1xf32>
    %13 = vector.broadcast %5 : vector<16x1xf32> to vector<16x32xf32>
    %14 = arith.subf %1, %13 : vector<16x32xf32>
    %cst_5 = arith.constant 9.99999974E-6 : f32
    %15 = vector.broadcast %cst_5 : f32 to vector<16x1xf32>
    %16 = arith.addf %12, %15 : vector<16x1xf32>
    %17 = math.rsqrt %16 : vector<16x1xf32>
    %18 = vector.broadcast %17 : vector<16x1xf32> to vector<16x32xf32>
    %19 = arith.mulf %14, %18 : vector<16x32xf32>
    %c0_6 = arith.constant 0 : index
    %c0_7 = arith.constant 0 : index
    %20 = vector.load %arg2[%c0_6, %c0_7] : memref<1x32xf32, #tpu.memory_space<vmem>>, vector<1x32xf32>
    %21 = vector.broadcast %20 : vector<1x32xf32> to vector<16x32xf32>
    %22 = arith.mulf %19, %21 : vector<16x32xf32>
    %c0_8 = arith.constant 0 : index
    %c0_9 = arith.constant 0 : index
    %23 = vector.load %arg3[%c0_8, %c0_9] : memref<1x32xf32, #tpu.memory_space<vmem>>, vector<1x32xf32>
    %24 = vector.broadcast %23 : vector<1x32xf32> to vector<16x32xf32>
    %25 = arith.addf %22, %24 : vector<16x32xf32>
    %26 = arith.truncf %25 : vector<16x32xf32> to vector<16x32xbf16>
    %27 = vector.shape_cast %26 : vector<16x32xbf16> to vector<1x16x32xbf16>
    %28 = vector.shape_cast %27 : vector<1x16x32xbf16> to vector<1x16x32xbf16>
    %29 = vector.broadcast %28 : vector<1x16x32xbf16> to vector<12x16x32xbf16>
    %c0_10 = arith.constant 0 : index
    %c0_11 = arith.constant 0 : index
    %c0_12 = arith.constant 0 : index
    %30 = vector.load %arg4[%c0_10, %c0_11, %c0_12] : memref<12x32x16xbf16, #tpu.memory_space<vmem>>, vector<12x32x16xbf16>
    "tpu.trace_start"() <{level = 10 : i32, message = "hnd,hde->hne"}> : () -> ()
    %cst_13 = arith.constant dense<0.000000e+00> : vector<12x16x16xf32>
    %31 = tpu.matmul %29, %30, %cst_13 {dimension_numbers = #tpu.dot_dimension_numbers<[2], [1], [1], [2], [0, 0, 0, 1, 1, 2], [0], [0]>} : vector<12x16x32xbf16>, vector<12x32x16xbf16>, vector<12x16x16xf32> -> vector<12x16x16xf32>
    "tpu.trace_stop"() : () -> ()
    %32 = vector.extract_strided_slice %31 {offsets = [0, 0, 0], sizes = [4, 16, 16], strides = [1, 1, 1]} : vector<12x16x16xf32> to vector<4x16x16xf32>
    %33 = arith.truncf %32 : vector<4x16x16xf32> to vector<4x16x16xbf16>
    %34 = vector.extract_strided_slice %31 {offsets = [4, 0, 0], sizes = [4, 16, 16], strides = [1, 1, 1]} : vector<12x16x16xf32> to vector<4x16x16xf32>
    %35 = arith.truncf %34 : vector<4x16x16xf32> to vector<4x16x16xbf16>
    %36 = vector.extract_strided_slice %31 {offsets = [8, 0, 0], sizes = [4, 16, 16], strides = [1, 1, 1]} : vector<12x16x16xf32> to vector<4x16x16xf32>
    %37 = arith.truncf %36 : vector<4x16x16xf32> to vector<4x16x16xbf16>
    "tpu.trace_start"() <{level = 10 : i32, message = "hnd,hmd->hnm"}> : () -> ()
    %cst_14 = arith.constant dense<0.000000e+00> : vector<4x16x16xf32>
    %38 = tpu.matmul %33, %35, %cst_14 {dimension_numbers = #tpu.dot_dimension_numbers<[2], [2], [1], [1], [0, 0, 0, 1, 1, 1], [0], [0]>} : vector<4x16x16xbf16>, vector<4x16x16xbf16>, vector<4x16x16xf32> -> vector<4x16x16xf32>
    "tpu.trace_stop"() : () -> ()
    %39 = tpu.iota {dimensions = array<i32: 0>} : vector<16x16xi32>
    %40 = tpu.iota {dimensions = array<i32: 1>} : vector<16x16xi32>
    %41 = arith.subi %39, %40 : vector<16x16xi32>
    %42 = math.absi %41 : vector<16x16xi32>
    %c0_i32 = arith.constant 0 : i32
    %43 = vector.broadcast %c0_i32 : i32 to vector<16x16xi32>
    %44 = arith.subi %43, %42 : vector<16x16xi32>
    %45 = arith.sitofp %44 : vector<16x16xi32> to vector<16x16xf32>
    %c0_15 = arith.constant 0 : index
    %c0_16 = arith.constant 0 : index
    %c0_17 = arith.constant 0 : index
    %46 = vector.load %arg6[%c0_15, %c0_16, %c0_17] : memref<4x1x1xf32, #tpu.memory_space<vmem>>, vector<4x1x1xf32>
    %47 = vector.shape_cast %45 : vector<16x16xf32> to vector<1x16x16xf32>
    %48 = vector.broadcast %46 : vector<4x1x1xf32> to vector<4x16x16xf32>
    %49 = vector.broadcast %47 : vector<1x16x16xf32> to vector<4x16x16xf32>
    %50 = arith.mulf %48, %49 : vector<4x16x16xf32>
    %51 = arith.addf %38, %50 : vector<4x16x16xf32>
    %cst_18 = arith.constant dense<0xFF800000> : vector<4x16xf32>
    %52 = vector.multi_reduction <maximumf>, %51, %cst_18 [2] : vector<4x16x16xf32> to vector<4x16xf32>
    %53 = vector.shape_cast %52 : vector<4x16xf32> to vector<4x16x1xf32>
    %54 = vector.broadcast %53 : vector<4x16x1xf32> to vector<4x16x16xf32>
    %55 = arith.subf %51, %54 : vector<4x16x16xf32>
    %56 = math.exp %55 : vector<4x16x16xf32>
    %cst_19 = arith.constant dense<0.000000e+00> : vector<4x16xf32>
    %57 = vector.multi_reduction <add>, %56, %cst_19 [2] : vector<4x16x16xf32> to vector<4x16xf32>
    %58 = vector.shape_cast %57 : vector<4x16xf32> to vector<4x16x1xf32>
    %59 = tpu.reciprocal %58 {approx = true} : vector<4x16x1xf32> -> vector<4x16x1xf32>
    %60 = vector.broadcast %59 : vector<4x16x1xf32> to vector<4x16x16xf32>
    %61 = arith.mulf %56, %60 : vector<4x16x16xf32>
    %62 = arith.truncf %61 : vector<4x16x16xf32> to vector<4x16x16xbf16>
    "tpu.trace_start"() <{level = 10 : i32, message = "hnm,hmd->hnd"}> : () -> ()
    %cst_20 = arith.constant dense<0.000000e+00> : vector<4x16x16xf32>
    %63 = tpu.matmul %62, %37, %cst_20 {dimension_numbers = #tpu.dot_dimension_numbers<[2], [1], [1], [2], [0, 0, 0, 1, 1, 2], [0], [0]>} : vector<4x16x16xbf16>, vector<4x16x16xbf16>, vector<4x16x16xf32> -> vector<4x16x16xf32>
    "tpu.trace_stop"() : () -> ()
    %64 = arith.truncf %63 : vector<4x16x16xf32> to vector<4x16x16xbf16>
    %c0_21 = arith.constant 0 : index
    %c0_22 = arith.constant 0 : index
    %c0_23 = arith.constant 0 : index
    %65 = vector.load %arg5[%c0_21, %c0_22, %c0_23] : memref<4x16x32xbf16, #tpu.memory_space<vmem>>, vector<4x16x32xbf16>
    "tpu.trace_start"() <{level = 10 : i32, message = "hnd,hdf->hnf"}> : () -> ()
    %cst_24 = arith.constant dense<0.000000e+00> : vector<4x16x32xf32>
    %66 = tpu.matmul %64, %65, %cst_24 {dimension_numbers = #tpu.dot_dimension_numbers<[2], [1], [1], [2], [0, 0, 0, 1, 1, 2], [0], [0]>} : vector<4x16x16xbf16>, vector<4x16x32xbf16>, vector<4x16x32xf32> -> vector<4x16x32xf32>
    "tpu.trace_stop"() : () -> ()
    %cst_25 = arith.constant dense<0.000000e+00> : vector<16x32xf32>
    %67 = vector.multi_reduction <add>, %66, %cst_25 [0] : vector<4x16x32xf32> to vector<16x32xf32>
    %c0_26 = arith.constant 0 : index
    %c0_27 = arith.constant 0 : index
    %c0_28 = arith.constant 0 : index
    %68 = vector.load %arg7[%c0_26, %c0_27, %c0_28] : memref<1x16x32xf32, #tpu.memory_space<vmem>>, vector<1x16x32xf32>
    %69 = vector.shape_cast %68 : vector<1x16x32xf32> to vector<16x32xf32>
    %70 = vector.shape_cast %67 : vector<16x32xf32> to vector<1x16x32xf32>
    tpu.vector_store %arg7[%c0_26, %c0_27, %c0_28], %70 {strides = array<i32>} : memref<1x16x32xf32, #tpu.memory_space<vmem>>, vector<1x16x32xf32>,
    return
  }
  func.func @transform_0(%arg0: i32) -> (i32, i32, i32) {
    %c0_i32 = arith.constant 0 : i32
    %c0_i32_0 = arith.constant 0 : i32
    %c0_i32_1 = arith.constant 0 : i32
    return %arg0, %c0_i32, %c0_i32_0 : i32, i32, i32
  }
  func.func @transform_1(%arg0: i32) -> (i32, i32) {
    %c0_i32 = arith.constant 0 : i32
    %c0_i32_0 = arith.constant 0 : i32
    %c0_i32_1 = arith.constant 0 : i32
    return %c0_i32, %c0_i32_0 : i32, i32
  }
  func.func @transform_2(%arg0: i32) -> (i32, i32) {
    %c0_i32 = arith.constant 0 : i32
    %c0_i32_0 = arith.constant 0 : i32
    %c0_i32_1 = arith.constant 0 : i32
    return %c0_i32, %c0_i32_0 : i32, i32
  }
  func.func @transform_3(%arg0: i32) -> (i32, i32, i32) {
    %c0_i32 = arith.constant 0 : i32
    %c0_i32_0 = arith.constant 0 : i32
    %c0_i32_1 = arith.constant 0 : i32
    %c0_i32_2 = arith.constant 0 : i32
    return %c0_i32, %c0_i32_0, %c0_i32_1 : i32, i32, i32
  }
  func.func @transform_4(%arg0: i32) -> (i32, i32, i32) {
    %c0_i32 = arith.constant 0 : i32
    %c0_i32_0 = arith.constant 0 : i32
    %c0_i32_1 = arith.constant 0 : i32
    %c0_i32_2 = arith.constant 0 : i32
    return %c0_i32, %c0_i32_0, %c0_i32_1 : i32, i32, i32
  }
  func.func @transform_5(%arg0: i32) -> (i32, i32, i32) {
    %c0_i32 = arith.constant 0 : i32
    %c0_i32_0 = arith.constant 0 : i32
    %c0_i32_1 = arith.constant 0 : i32
    %c0_i32_2 = arith.constant 0 : i32
    return %c0_i32, %c0_i32_0, %c0_i32_1 : i32, i32, i32
  }
  func.func @transform_6(%arg0: i32) -> (i32, i32, i32) {
    %c0_i32 = arith.constant 0 : i32
    %c0_i32_0 = arith.constant 0 : i32
    %c0_i32_1 = arith.constant 0 : i32
    return %arg0, %c0_i32, %c0_i32_0 : i32, i32, i32
  }
}

</mosaic_0001>

<bundles_post_ra>
// kernel: tpu_custom_call.1
= control target key start
LH: loop header
LB: loop body
LE: loop exit
PB: predicated region body
PF: predicated region fallthrough
CT: control target
= control target key end

     0   :  { %11 = vsyncpa [#allocation3], 0  ;;  %s2721_s0 = inlined_call_operand.vmem [shape: f32[2,16,32], index: 0, kind: input, shape index: {}]   ;;  %s2722_s1 = inlined_call_operand.vmem [shape: f32[1,32], index: 1, kind: input, shape index: {}]   ;;  %s2723_s2 = inlined_call_operand.vmem [shape: f32[1,32], index: 2, kind: input, shape index: {}]   ;;  %s2724_s3 = inlined_call_operand.vmem [shape: bf16[12,32,16], index: 3, kind: input, shape index: {}]   ;;  %s2725_s4 = inlined_call_operand.vmem [shape: bf16[4,16,32], index: 4, kind: input, shape index: {}]   ;;  %s2726_s5 = inlined_call_operand.vmem [shape: f32[4,1,1], index: 5, kind: input, shape index: {}]   ;;  %s2727_s6 = inlined_call_operand.hbm [shape: f32[2,16,32], index: 6, kind: output, shape index: {}]  }
   0x1   :  { %13 = vsyncpa [#allocation3 + $0x1], 0  ;;  %s2342_s21 = smov 0   ;;  %s2344_s22 = smov 0  }
   0x2   :  { %s2346_s23 = smov 0   ;;  %s2348_s24 = smov 0  }
   0x3 LB: > { %s2363_s25 = sadd.s32 4294967295, %s2299_s24   ;;  %s1825_s26 = sadd.s32 4294967294, %s2299_s24   ;;  %s2299_s24 = sphi %s2348_s24, %s2733_s24   ;;  %s2295_s23 = sphi %s2346_s23, %s2732_s23   ;;  %s2291_s22 = sphi %s2344_s22, %s2731_s22   ;;  %s2287_s21 = sphi %s2342_s21, %s2730_s21  }
   0x4   : > { %s2367_s27 = sadd.s32 1, %s2299_s24   ;;  %s157_s28 = sadd.s32 1, %s2295_s23 }
   0x5   : > { %s154_s29 = ssub.s32 %s2299_s24, %s2367_s27  ;;  %p167_p0 = scmp.ne.s32.totalorder %s2295_s23, %s2291_s22 }
   0x6   : > { %p155_p1 = scmp.eq.s32.totalorder %s154_s29, 0  ;;  %p168_p2 = scmp.eq.s32.totalorder %s2363_s25, 1 }
   0x7   : > { %p173_p3 = scmp.ne.s32.totalorder %s2291_s22, %s2287_s21  ;;  %p174_p4 = scmp.eq.s32.totalorder %s1825_s26, 1 }
   0x8   : > { %s2378_s30 = scalar_select %p155_p1, %s2295_s23, %s157_s28  }
   0x9   : > { %p2380_p5 = por %p168_p2, %p167_p0  ;;  %p2384_p6 = por %p174_p4, %p173_p3 }
   0xa   : > { %p1828_p7 = scmp.ge.s32.totalorder %s2299_s24, 1  ;;  %p215_p8 = scmp.lt.s32.totalorder %s2299_s24, 3 }
   0xc   : > { %p216_p9 = pnand %p1828_p7, %p215_p8 }
   0xd   : > { %p245_p10 = scmp.lt.s32.totalorder (!%p216_p9), %s2363_s25, 1  ;;  %vm253_vm0 = vcmask (!%p216_p9), 261120   ;;  %v2173_v14 = vld [vmem:[%s2724_s3] sm:$0xff] (!%p216_p9)   ;;  %v2174_v15 = vld [vmem:[%s2724_s3 + $0x10] sm:$0xff] (!%p216_p9)   ;;  %v2301_v16 = vmov (!%p216_p9), 0.0   ;;  %v2175_v17 = vld [vmem:[%s2724_s3 + $0x8] sm:$0xff] (!%p216_p9)  }
   0xe   : > { %219 = sbr.rel (%p216_p9) target bundleno = 1583 (0x62f), region = 44  ;;  %1959 = vmatprep.subr.bf16.mxu0 (!%p216_p9), %v2301_v16  ;;  %1967 = vmatprep.subr.bf16.mxu1 (!%p216_p9), %v2301_v16  ;;  %v2176_v18 = vld [vmem:[%s2724_s3 + $0x18] sm:$0xff] (!%p216_p9)   ;;  %vm2302_vm1 = vmmov (!%p216_p9), 0   ;;  %v1832_v27 = vld [vmem:[%s2722_s1] ss:$0 sm:$0xff] (!%p216_p9)  ;;  %v2178_v36 = vld [vmem:[%s2724_s3 + $0x30] sm:$0xff] (!%p216_p9)  }
   0xf   : > { %1960 = vmatpush3.bf16.msra.mxu0 (!%p216_p9), %v2173_v14  ;;  %1968 = vmatpush3.bf16.msra.mxu1 (!%p216_p9), %v2174_v15  ;;  %v1833_v31 = vld [vmem:[%s2723_s2] ss:$0 sm:$0xff] (!%p216_p9)  ;;  %v2179_v38 = vld [vmem:[%s2724_s3 + $0x28] sm:$0xff] (!%p216_p9)   ;;  %v2180_v39 = vld [vmem:[%s2724_s3 + $0x38] sm:$0xff] (!%p216_p9)   ;;  %v2303_v58 = vmov (!%p216_p9), 0   ;;  %vm1064_vm2 = vcmask (!%p216_p9), 130048  }
  0x10   : > { %1961 = vmatprep.subr.bf16.mxu0 (!%p216_p9), %v2301_v16  ;;  %1969 = vmatprep.subr.bf16.mxu1 (!%p216_p9), %v2301_v16  ;;  %v2177_v35 = vld [vmem:[%s2724_s3 + $0x20] sm:$0xff] (!%p216_p9)   ;;  %v2182_v41 = vld [vmem:[%s2724_s3 + $0x50] sm:$0xff] (!%p216_p9)   ;;  %v2183_v42 = vld [vmem:[%s2724_s3 + $0x48] sm:$0xff] (!%p216_p9)   ;;  %s242_s28 = sand.u32 (!%p216_p9), 1, %s2291_s22   ;;  %s1898_s11 = sshll.u32 (!%p216_p9), %s2363_s25, 8 }
  0x11   : > { %1963 = vmatprep.mubr.msk.bf16.mxu0 (!%p216_p9), %vm2302_vm1, %v2301_v16  ;;  %1971 = vmatprep.mubr.msk.bf16.mxu1 (!%p216_p9), %vm2302_vm1, %v2301_v16  ;;  %v2181_v40 = vld [vmem:[%s2724_s3 + $0x40] sm:$0xff] (!%p216_p9)   ;;  %v2184_v43 = vld [vmem:[%s2724_s3 + $0x58] sm:$0xff] (!%p216_p9)   ;;  %v2186_v45 = vld [vmem:[%s2724_s3 + $0x70] sm:$0xff] (!%p216_p9)   ;;  %s1829_s29 = sshll.u32 (!%p216_p9), %s242_s28, 4  ;;  %s2677_s14 = scalar_lea.hbm (!%p216_p9), %s2727_s6, %s1898_s11 }
  0x12   : > { %v2185_v44 = vld [vmem:[%s2724_s3 + $0x60] sm:$0xff] (!%p216_p9)   ;;  %v2187_v46 = vld [vmem:[%s2724_s3 + $0x68] sm:$0xff] (!%p216_p9)   ;;  %v2188_v47 = vld [vmem:[%s2724_s3 + $0x78] sm:$0xff] (!%p216_p9)   ;;  %2172 = vset.pattern.permute.xlu1 (!%p216_p9), %v2303_v58  ;;  %2171 = vset.pattern.permute.xlu0 (!%p216_p9), %v2303_v58  ;;  %s2304_s16 = smov (!%p216_p9), [#allocation2]  }
  0x13   : > { %1962 = vmatpush3.bf16.msra.mxu0 (!%p216_p9), %v2175_v17  ;;  %1970 = vmatpush3.bf16.msra.mxu1 (!%p216_p9), %v2176_v18  ;;  %v2189_v48 = vld [vmem:[%s2724_s3 + $0x80] sm:$0xff] (!%p216_p9)   ;;  %v2190_v49 = vld [vmem:[%s2724_s3 + $0x90] sm:$0xff] (!%p216_p9)   ;;  %v2191_v50 = vld [vmem:[%s2724_s3 + $0x88] sm:$0xff] (!%p216_p9)   ;;  %s2241_s17 = sshll.u32 (!%p216_p9), %s2304_s16, 4  ;;  %s2242_s17 = int_to_ptr.vmem [resolvable:$false] %s2241_s17 }
  0x14   : > { %1975 = vmatprep.subr.bf16.mxu0 (!%p216_p9), %v2301_v16  ;;  %1983 = vmatprep.subr.bf16.mxu1 (!%p216_p9), %v2301_v16  ;;  %v2192_v51 = vld [vmem:[%s2724_s3 + $0x98] sm:$0xff] (!%p216_p9)   ;;  %v2193_v52 = vld [vmem:[%s2724_s3 + $0xa0] sm:$0xff] (!%p216_p9)   ;;  %v2194_v53 = vld [vmem:[%s2724_s3 + $0xb0] sm:$0xff] (!%p216_p9)   ;;  %s2243_s18 = scalar_lea.vmem (!%p216_p9), %s2242_s17, 512 }
  0x15   : > { %s246_s9 = scalar_select %p245_p10, %s2363_s25, 1  ;;  %v2195_v54 = vld [vmem:[%s2724_s3 + $0xa8] sm:$0xff]   ;;  %v2196_v55 = vld [vmem:[%s2724_s3 + $0xb8] sm:$0xff]   ;;  %v1873_v56 = vld [vmem:[%s2726_s5 + $0x1] ss:$0 sm:$0xff] }
  0x16   : > { %v1872_v57 = vld [vmem:[%s2726_s5] ss:$0 sm:$0xff]  ;;  %v1874_v59 = vld [vmem:[%s2726_s5 + $0x2] ss:$0 sm:$0xff]  ;;  %v1875_v60 = vld [vmem:[%s2726_s5 + $0x3] ss:$0 sm:$0xff] }
  0x17   : > { %s1897_s10 = sshll.u32 %s246_s9, 4  ;;  %s244_s9 = scalar_lea.vmem [#allocation2], %s1829_s29 }
  0x18   : > { %s249_s13 = scalar_lea.vmem %s2721_s0, %s1897_s10  ;;  %s1763_s10 = sshll.u32 %s244_s9, 4  ;;  %s2670_s10 = int_to_ptr.vmem [resolvable:$true] %s1763_s10 }
  0x19   : > { %v251_v0 = vld [vmem:[%s249_s13] sm:$0xff]  ;;  %v252_v1 = vld [vmem:[%s249_s13 + $0x8] sm:$0xff]  ;;  %s2680_s25 = scalar_lea.sflag [#allocation3], %s242_s28  ;;  %s2237_s15 = scalar_lea.vmem %s2670_s10, 256 }
  0x1a   : > { %v254_v2 = vsel %vm253_vm0, %v251_v0, 0.0  ;;  %v257_v3 = vsel %vm253_vm0, %v252_v1, 0.0  ;;  %p2238_p11 = scmp.ne.s32.totalorder %s2670_s10, %s2237_s15  ;;  %p2244_p0 = scmp.lt.s32.totalorder %s2670_s10, %s2242_s17 }
  0x1b   : > { %255 = vadd.xlane.f32.xlu0 %v254_v2  ;;  %p2245_p1 = scmp.lt.s32.totalorder %s2243_s18, %s2237_s15 }
  0x1c   : > { %p2239_p12 = pnand %p2238_p11, %p2380_p5 }
  0x1d   : > { %p2246_p2 = por %p2245_p1, %p2244_p0 }
  0x1e   : > { %p2240_p13 = pneg %p2239_p12 }
  0x1f   : > { %258 = vadd.xlane.f32.xlu0 %v257_v3 }
  0x20   : > { %p2247_p3 = pnand %p2246_p2, %p2240_p13 }
  0x35   : > { %1041 = vperm.xlu0 %2171, %v1872_v57  }
  0xa8   : > { %v256_v4 = vpop.xlane.xlu0 %255 }
  0xa9   : > { %v261_v5 = vmul.f32 0.03125, %v256_v4 }
  0xab   : > { %v263_v6 = vsub.f32 %v251_v0, %v261_v5 }
  0xac   : > { %v259_v7 = vpop.xlane.xlu0 %258 }
  0xad   : > { %v262_v8 = vmul.f32 0.03125, %v259_v7  ;;  %v265_v9 = vmul.f32 %v263_v6, %v263_v6 }
  0xaf   : > { %v264_v10 = vsub.f32 %v252_v1, %v262_v8  ;;  %v267_v11 = vsel %vm253_vm0, %v265_v9, 0.0 }
  0xb0   : > { %268 = vadd.xlane.f32.xlu1 %v267_v11 }
  0xb1   : > { %v266_v12 = vmul.f32 %v264_v10, %v264_v10 }
  0xb3   : > { %v270_v13 = vsel %vm253_vm0, %v266_v12, 0.0 }
  0xb4   : > { %271 = vadd.xlane.f32.xlu1 %v270_v13 }
  0xc5   : > { %1045 = vperm.xlu1 %2172, %v1873_v56  }
  0xc9   : > { %1049 = vperm.xlu1 %2172, %v1874_v59  }
  0xcd   : > { %1053 = vperm.xlu1 %2172, %v1875_v60  }
 0x13d   : > { %v269_v19 = vpop.xlane.xlu1 %268 }
 0x13e   : > { %v273_v20 = vmul.f32 0.03125, %v269_v19 }
 0x140   : > { %v275_v21 = vadd.f32 1e-05, %v273_v20 }
 0x141   : > { %v272_v22 = vpop.xlane.xlu1 %271 }
 0x142   : > { %2201 = vrsqrt.f32 %v275_v21  ;;  %v274_v23 = vmul.f32 0.03125, %v272_v22 }
 0x144   : > { %v276_v24 = vadd.f32 1e-05, %v274_v23 }
 0x146   : > { %2203 = vrsqrt.f32 %v276_v24 }
 0x14c   : > { %v2202_v25 = vpop.eup %2201 }
 0x14d   : > { %v279_v26 = vmul.f32 %v2202_v25, %v263_v6 }
 0x14f   : > { %v288_v29 = vmul.f32 %v1832_v27, %v279_v26 }
 0x150   : > { %v2204_v28 = vpop.eup %2203 }
 0x151   : > { %v280_v30 = vmul.f32 %v2204_v28, %v264_v10  ;;  %v297_v33 = vadd.f32 %v1833_v31, %v288_v29 }
 0x153   : > { %v289_v32 = vmul.f32 %v1832_v27, %v280_v30 }
 0x155   : > { %v298_v34 = vadd.f32 %v1833_v31, %v289_v32 }
 0x157   : > { %v2433_v37 = vpack.c.bf16 %v298_v34, %v297_v33 }
 0x159   : > { %1964 = vmatmul.mubr.msk.bf16.vlgmr.msra.gmra.mrb[0].mxu0 %vm253_vm0, %v2433_v37  ;;  %1972 = vmatmul.mubr.msk.bf16.vlgmr.msra.gmra.mrb[0].mxu1 %vm253_vm0, %v2433_v37 }
 0x15a   : > { %1976 = vmatpush3.bf16.msra.mxu0 %v2177_v35  ;;  %1984 = vmatpush3.bf16.msra.mxu1 %v2178_v36 }
 0x15b   : > { %1977 = vmatprep.subr.bf16.mxu0 %v2301_v16  ;;  %1985 = vmatprep.subr.bf16.mxu1 %v2301_v16 }
 0x15c   : > { %1979 = vmatprep.mubr.msk.bf16.mxu0 %vm2302_vm1, %v2301_v16  ;;  %1987 = vmatprep.mubr.msk.bf16.mxu1 %vm2302_vm1, %v2301_v16 }
 0x15e   : > { %1978 = vmatpush3.bf16.msra.mxu0 %v2179_v38  ;;  %1986 = vmatpush3.bf16.msra.mxu1 %v2180_v39 }
 0x15f   : > { %1991 = vmatprep.subr.bf16.mxu0 %v2301_v16  ;;  %1999 = vmatprep.subr.bf16.mxu1 %v2301_v16 }
 0x161   : > { %1980 = vmatmul.mubr.msk.bf16.vlgmr.msra.gmra.mrb[4].mxu0 %vm253_vm0, %v2433_v37  ;;  %1988 = vmatmul.mubr.msk.bf16.vlgmr.msra.gmra.mrb[4].mxu1 %vm253_vm0, %v2433_v37 }
 0x162   : > { %1992 = vmatpush3.bf16.msra.mxu0 %v2181_v40  ;;  %2000 = vmatpush3.bf16.msra.mxu1 %v2182_v41 }
 0x163   : > { %1993 = vmatprep.subr.bf16.mxu0 %v2301_v16  ;;  %2001 = vmatprep.subr.bf16.mxu1 %v2301_v16 }
 0x164   : > { %1995 = vmatprep.mubr.msk.bf16.mxu0 %vm2302_vm1, %v2301_v16  ;;  %2003 = vmatprep.mubr.msk.bf16.mxu1 %vm2302_vm1, %v2301_v16 }
 0x166   : > { %1994 = vmatpush3.bf16.msra.mxu0 %v2183_v42  ;;  %2002 = vmatpush3.bf16.msra.mxu1 %v2184_v43 }
 0x167   : > { %2007 = vmatprep.subr.bf16.mxu0 %v2301_v16  ;;  %2015 = vmatprep.subr.bf16.mxu1 %v2301_v16 }
 0x169   : > { %1996 = vmatmul.mubr.msk.bf16.vlgmr.msra.gmra.mrb[8].mxu0 %vm253_vm0, %v2433_v37  ;;  %2004 = vmatmul.mubr.msk.bf16.vlgmr.msra.gmra.mrb[8].mxu1 %vm253_vm0, %v2433_v37 }
 0x16a   : > { %2008 = vmatpush3.bf16.msra.mxu0 %v2185_v44  ;;  %2016 = vmatpush3.bf16.msra.mxu1 %v2186_v45 }
 0x16b   : > { %2009 = vmatprep.subr.bf16.mxu0 %v2301_v16  ;;  %2017 = vmatprep.subr.bf16.mxu1 %v2301_v16 }
 0x16c   : > { %2011 = vmatprep.mubr.msk.bf16.mxu0 %vm2302_vm1, %v2301_v16  ;;  %2019 = vmatprep.mubr.msk.bf16.mxu1 %vm2302_vm1, %v2301_v16 }
 0x16e   : > { %2010 = vmatpush3.bf16.msra.mxu0 %v2187_v46  ;;  %2018 = vmatpush3.bf16.msra.mxu1 %v2188_v47 }
 0x16f   : > { %2023 = vmatprep.subr.bf16.mxu0 %v2301_v16  ;;  %2031 = vmatprep.subr.bf16.mxu1 %v2301_v16 }
 0x171   : > { %2012 = vmatmul.mubr.msk.bf16.vlgmr.msra.gmra.mrb[12].mxu0 %vm253_vm0, %v2433_v37  ;;  %2020 = vmatmul.mubr.msk.bf16.vlgmr.msra.gmra.mrb[12].mxu1 %vm253_vm0, %v2433_v37 }
 0x172   : > { %2024 = vmatpush3.bf16.msra.mxu0 %v2189_v48  ;;  %2032 = vmatpush3.bf16.msra.mxu1 %v2190_v49 }
 0x173   : > { %2025 = vmatprep.subr.bf16.mxu0 %v2301_v16  ;;  %2033 = vmatprep.subr.bf16.mxu1 %v2301_v16 }
 0x174   : > { %2027 = vmatprep.mubr.msk.bf16.mxu0 %vm2302_vm1, %v2301_v16  ;;  %2035 = vmatprep.mubr.msk.bf16.mxu1 %vm2302_vm1, %v2301_v16 }
 0x176   : > { %2026 = vmatpush3.bf16.msra.mxu0 %v2191_v50  ;;  %2034 = vmatpush3.bf16.msra.mxu1 %v2192_v51 }
 0x177   : > { %2039 = vmatprep.subr.bf16.mxu0 %v2301_v16  ;;  %2047 = vmatprep.subr.bf16.mxu1 %v2301_v16 }
 0x179   : > { %2028 = vmatmul.mubr.msk.bf16.vlgmr.msra.gmra.mrb[16].mxu0 %vm253_vm0, %v2433_v37  ;;  %2036 = vmatmul.mubr.msk.bf16.vlgmr.msra.gmra.mrb[16].mxu1 %vm253_vm0, %v2433_v37 }
 0x17a   : > { %2040 = vmatpush3.bf16.msra.mxu0 %v2193_v52  ;;  %2048 = vmatpush3.bf16.msra.mxu1 %v2194_v53 }
 0x17b   : > { %2041 = vmatprep.subr.bf16.mxu0 %v2301_v16  ;;  %2049 = vmatprep.subr.bf16.mxu1 %v2301_v16 }
 0x17c   : > { %2043 = vmatprep.mubr.msk.bf16.mxu0 %vm2302_vm1, %v2301_v16  ;;  %2051 = vmatprep.mubr.msk.bf16.mxu1 %vm2302_vm1, %v2301_v16 }
 0x17e   : > { %2042 = vmatpush3.bf16.msra.mxu0 %v2195_v54  ;;  %2050 = vmatpush3.bf16.msra.mxu1 %v2196_v55 }
 0x17f   : > { %2055 = vmatprep.subr.bf16.mxu0 %v2301_v16  ;;  %2061 = vmatprep.subr.bf16.mxu1 %v2301_v16 }
 0x181   : > { %2044 = vmatmul.mubr.msk.bf16.vlgmr.msra.gmra.mrb[20].mxu0 %vm253_vm0, %v2433_v37  ;;  %2052 = vmatmul.mubr.msk.bf16.vlgmr.msra.gmra.mrb[20].mxu1 %vm253_vm0, %v2433_v37 }
 0x182   : > { %2057 = vmatprep.mubr.msk.bf16.mxu0 %vm2302_vm1, %v2301_v16  ;;  %2063 = vmatprep.mubr.msk.bf16.mxu1 %vm2302_vm1, %v2301_v16 }
 0x22c   : > { %v397_v61 = vpop.f32.mrb[0].mxu0  ;;  %v450_v62 = vpop.f32.mrb[0].mxu1 }
 0x22d   : > { %v1965_v63 = vpop.f32.mrb[1].mxu0  ;;  %v1973_v0 = vpop.f32.mrb[1].mxu1 }
 0x22e   : > { %v400_v1 = vpop.f32.mrb[2].mxu0  ;;  %v453_v2 = vpop.f32.mrb[2].mxu1 }
 0x22f   : > { %v987_v3 = vpack.c.bf16 %v400_v1, %v397_v61  ;;  %v988_v4 = vpack.c.bf16 %v453_v2, %v450_v62  ;;  %v1966_v5 = vpop.f32.mrb[3].mxu0  ;;  %v1974_v6 = vpop.f32.mrb[3].mxu1  ;;  %v999_v62 = vlaneseq }
 0x231   : > { %v1000_v63 = vshrl.u32 %v999_v62, 7  ;;  %v1003_v0 = vand.u32 127, %v999_v62 }
 0x233   : > { %v1001_v1 = vadd.s32 8, %v1000_v63  ;;  %v1004_v2 = vsub.s32 %v1000_v63, %v1003_v0 }
 0x234   : > { %v503_v7 = vpop.f32.mrb[4].mxu0  ;;  %v556_v8 = vpop.f32.mrb[4].mxu1 }
 0x235   : > { %v1981_v9 = vpop.f32.mrb[5].mxu0  ;;  %v1989_v10 = vpop.f32.mrb[5].mxu1 }
 0x236   : > { %v506_v11 = vpop.f32.mrb[6].mxu0  ;;  %v559_v12 = vpop.f32.mrb[6].mxu1 }
 0x237   : > { %v989_v13 = vpack.c.bf16 %v506_v11, %v503_v7  ;;  %v990_v14 = vpack.c.bf16 %v559_v12, %v556_v8  ;;  %v1982_v15 = vpop.f32.mrb[7].mxu0  ;;  %v1990_v17 = vpop.f32.mrb[7].mxu1 }
 0x238   : > { %v1046_v9 = vpop.permute.xlu1 %1045  ;;  %v1042_v12 = vpop.permute.xlu0 %1041 }
 0x23c   : > { %v609_v18 = vpop.f32.mrb[8].mxu0  ;;  %v662_v19 = vpop.f32.mrb[8].mxu1 }
 0x23d   : > { %v1997_v20 = vpop.f32.mrb[9].mxu0  ;;  %v2005_v21 = vpop.f32.mrb[9].mxu1 }
 0x23e   : > { %v612_v22 = vpop.f32.mrb[10].mxu0  ;;  %v665_v23 = vpop.f32.mrb[10].mxu1 }
 0x23f   : > { %v991_v24 = vpack.c.bf16 %v612_v22, %v609_v18  ;;  %v992_v25 = vpack.c.bf16 %v665_v23, %v662_v19  ;;  %v1998_v26 = vpop.f32.mrb[11].mxu0  ;;  %v2006_v27 = vpop.f32.mrb[11].mxu1 }
 0x240   : > { %v1050_v15 = vpop.permute.xlu1 %1049 }
 0x241   : > { %v1069_v28 = vsel %vm1064_vm2, %v991_v24, 0  ;;  %v1116_v29 = vsel %vm1064_vm2, %v992_v25, 0 }
 0x242   : > { %2056 = vmatpush3.bf16.xpose.msra.mxu0 %v1069_v28  ;;  %2062 = vmatpush3.bf16.xpose.msra.mxu1 %v1116_v29 }
 0x243   : > { %2067 = vmatprep.subr.bf16.mxu0 %v2301_v16  ;;  %2073 = vmatprep.subr.bf16.mxu1 %v2301_v16 }
 0x244   : > { %v715_v30 = vpop.f32.mrb[12].mxu0  ;;  %v768_v31 = vpop.f32.mrb[12].mxu1 }
 0x245   : > { %v2013_v32 = vpop.f32.mrb[13].mxu0  ;;  %v2021_v33 = vpop.f32.mrb[13].mxu1 }
 0x246   : > { %v718_v34 = vpop.f32.mrb[14].mxu0  ;;  %v771_v35 = vpop.f32.mrb[14].mxu1 }
 0x247   : > { %v993_v36 = vpack.c.bf16 %v718_v34, %v715_v30  ;;  %v994_v37 = vpack.c.bf16 %v771_v35, %v768_v31  ;;  %v2014_v38 = vpop.f32.mrb[15].mxu0  ;;  %v2022_v39 = vpop.f32.mrb[15].mxu1 }
 0x248   : > { %v1054_v32 = vpop.permute.xlu1 %1053 }
 0x249   : > { %v1163_v40 = vsel %vm1064_vm2, %v993_v36, 0  ;;  %v1210_v41 = vsel %vm1064_vm2, %v994_v37, 0  ;;  %2058 = vmatmul.mubr.msk.bf16.vlgmr.msra.gmra.mrb[24].mxu0 %vm1064_vm2, %v987_v3  ;;  %2064 = vmatmul.mubr.msk.bf16.vlgmr.msra.gmra.mrb[24].mxu1 %vm1064_vm2, %v988_v4  ;;  %v1005_v3 = vsub.s32 %v1001_v1, %v1003_v0  ;;  %v1007_v4 = vsub.s32 0, %v1004_v2 }
 0x24a   : > { %2068 = vmatpush3.bf16.xpose.msra.mxu0 %v1163_v40  ;;  %2074 = vmatpush3.bf16.xpose.msra.mxu1 %v1210_v41 }
 0x24b   : > { %2069 = vmatprep.mubr.msk.bf16.mxu0 %vm2302_vm1, %v2301_v16  ;;  %2075 = vmatprep.mubr.msk.bf16.mxu1 %vm2302_vm1, %v2301_v16  ;;  %v1870_v5 = vmin.u32 %v1007_v4, %v1004_v2  ;;  %v1010_v6 = vsub.s32 0, %v1005_v3 }
 0x24c   : > { %v821_v42 = vpop.f32.mrb[16].mxu0  ;;  %v874_v43 = vpop.f32.mrb[16].mxu1  ;;  %2079 = vmatprep.subr.bf16.mxu0 %v2301_v16  ;;  %2085 = vmatprep.subr.bf16.mxu1 %v2301_v16 }
 0x24d   : > { %v2029_v44 = vpop.f32.mrb[17].mxu0  ;;  %v2037_v45 = vpop.f32.mrb[17].mxu1  ;;  %v1871_v7 = vmin.u32 %v1010_v6, %v1005_v3  ;;  %v1012_v8 = vsub.s32 0, %v1870_v5 }
 0x24e   : > { %v824_v46 = vpop.f32.mrb[18].mxu0  ;;  %v877_v47 = vpop.f32.mrb[18].mxu1 }
 0x24f   : > { %v995_v48 = vpack.c.bf16 %v824_v46, %v821_v42  ;;  %v996_v49 = vpack.c.bf16 %v877_v47, %v874_v43  ;;  %v2030_v50 = vpop.f32.mrb[19].mxu0  ;;  %v2038_v51 = vpop.f32.mrb[19].mxu1  ;;  %v1013_v10 = vsub.s32 0, %v1871_v7  ;;  %v1014_v11 = vcvt.s32.f32 %v1012_v8 }
 0x251   : > { %2070 = vmatmul.mubr.msk.bf16.vlgmr.msra.gmra.mrb[28].mxu0 %vm1064_vm2, %v989_v13  ;;  %2076 = vmatmul.mubr.msk.bf16.vlgmr.msra.gmra.mrb[28].mxu1 %vm1064_vm2, %v990_v14  ;;  %v1015_v13 = vcvt.s32.f32 %v1013_v10  ;;  %v1056_v14 = vmul.f32 %v1042_v12, %v1014_v11  ;;  %v1058_v17 = vmul.f32 %v1046_v9, %v1014_v11  ;;  %v1062_v35 = vmul.f32 %v1054_v32, %v1014_v11 }
 0x252   : > { %2080 = vmatpush3.bf16.msra.mxu0 %v995_v48  ;;  %2086 = vmatpush3.bf16.msra.mxu1 %v996_v49  ;;  %v1060_v39 = vmul.f32 %v1050_v15, %v1014_v11 }
 0x253   : > { %2081 = vmatprep.mubr.msk.bf16.mxu0 %vm2302_vm1, %v2301_v16  ;;  %2091 = vmatprep.subr.bf16.mxu0 %v2301_v16  ;;  %v1057_v20 = vmul.f32 %v1042_v12, %v1015_v13  ;;  %v1059_v26 = vmul.f32 %v1046_v9, %v1015_v13  ;;  %v1061_v50 = vmul.f32 %v1050_v15, %v1015_v13 }
 0x254   : > { %v2588_v52 = vpop.f32.mrb[20].mxu0  ;;  %v2590_v53 = vpop.f32.mrb[20].mxu1  ;;  %2087 = vmatprep.mubr.msk.bf16.mxu1 %vm2302_vm1, %v2301_v16  ;;  %2097 = vmatprep.subr.bf16.mxu1 %v2301_v16 }
 0x255   : > { %v2045_v54 = vpop.f32.mrb[21].mxu0  ;;  %v2053_v55 = vpop.f32.mrb[21].mxu1 }
 0x256   : > { %v2595_v56 = vpop.f32.mrb[22].mxu0  ;;  %v2597_v57 = vpop.f32.mrb[22].mxu1  ;;  %v1063_v55 = vmul.f32 %v1054_v32, %v1015_v13 }
 0x257   : > { %v997_v58 = vpack.c.bf16 %v2595_v56, %v2588_v52  ;;  %v998_v59 = vpack.c.bf16 %v2597_v57, %v2590_v53  ;;  %v2046_v60 = vpop.f32.mrb[23].mxu0  ;;  %v2054_v61 = vpop.f32.mrb[23].mxu1  ;;  %v2197_v53 = vld [vmem:[%s2725_s4] sm:$0xff]   ;;  %v2198_v57 = vld [vmem:[%s2725_s4 + $0x8] sm:$0xff]  }
 0x31c   : > { %v1105_v18 = vpop.f32.mrb[24].mxu0  ;;  %v1152_v19 = vpop.f32.mrb[24].mxu1 }
 0x31d   : > { %v1106_v21 = vadd.f32 %v1105_v18, %v1056_v14  ;;  %v2059_v22 = vpop.f32.mrb[25].mxu0  ;;  %v2065_v23 = vpop.f32.mrb[25].mxu1  ;;  %v1153_v27 = vadd.f32 %v1152_v19, %v1058_v17 }
 0x31e   : > { %v1108_v24 = vpop.f32.mrb[26].mxu0  ;;  %v1155_v25 = vpop.f32.mrb[26].mxu1 }
 0x31f   : > { %v1109_v28 = vadd.f32 %v1108_v24, %v1057_v20  ;;  %v2060_v29 = vpop.f32.mrb[27].mxu0  ;;  %v2066_v30 = vpop.f32.mrb[27].mxu1  ;;  %v1253_v31 = vsel %vm1064_vm2, %v1106_v21, -inf  ;;  %v1156_v34 = vadd.f32 %v1155_v25, %v1059_v26  ;;  %v1259_v36 = vsel %vm1064_vm2, %v1153_v27, -inf }
 0x320   : > { %1254 = vmax.xlane.f32.xlu1 %v1253_v31 }
 0x321   : > { %v1256_v33 = vsel %vm1064_vm2, %v1109_v28, -inf  ;;  %v1262_v49 = vsel %vm1064_vm2, %v1156_v34, -inf }
 0x322   : > { %1257 = vmax.xlane.f32.xlu0 %v1256_v33 }
 0x324   : > { %v1199_v37 = vpop.f32.mrb[28].mxu0  ;;  %v1246_v38 = vpop.f32.mrb[28].mxu1  ;;  %1260 = vmax.xlane.f32.xlu1 %v1259_v36 }
 0x325   : > { %v1247_v40 = vadd.f32 %v1246_v38, %v1062_v35  ;;  %v2071_v41 = vpop.f32.mrb[29].mxu0  ;;  %v2077_v42 = vpop.f32.mrb[29].mxu1  ;;  %v1200_v45 = vadd.f32 %v1199_v37, %v1060_v39 }
 0x326   : > { %v1202_v43 = vpop.f32.mrb[30].mxu0  ;;  %v1249_v44 = vpop.f32.mrb[30].mxu1 }
 0x327   : > { %v2072_v46 = vpop.f32.mrb[31].mxu0  ;;  %v2078_v47 = vpop.f32.mrb[31].mxu1  ;;  %v1271_v48 = vsel %vm1064_vm2, %v1247_v40, -inf  ;;  %v1203_v51 = vadd.f32 %v1202_v43, %v1061_v50  ;;  %v1265_v54 = vsel %vm1064_vm2, %v1200_v45, -inf  ;;  %v1250_v60 = vadd.f32 %v1249_v44, %v1063_v55 }
 0x328   : > { %1272 = vmax.xlane.f32.xlu0 %v1271_v48  ;;  %1263 = vmax.xlane.f32.xlu1 %v1262_v49 }
 0x329   : > { %v1268_v61 = vsel %vm1064_vm2, %v1203_v51, -inf  ;;  %v1274_v62 = vsel %vm1064_vm2, %v1250_v60, -inf }
 0x32c   : > { %1266 = vmax.xlane.f32.xlu1 %v1265_v54 }
 0x330   : > { %1269 = vmax.xlane.f32.xlu1 %v1268_v61 }
 0x334   : > { %1275 = vmax.xlane.f32.xlu1 %v1274_v62 }
 0x3ad   : > { %v1255_v63 = vpop.xlane.xlu1 %1254 }
 0x3ae   : > { %v1277_v0 = vsub.f32 %v1106_v21, %v1255_v63 }
 0x3af   : > { %v1258_v1 = vpop.xlane.xlu0 %1257 }
 0x3b0   : > { %v1285_v2 = vmul.f32 1.442695, %v1277_v0  ;;  %v1278_v3 = vsub.f32 %v1109_v28, %v1258_v1 }
 0x3b1   : > { %v1261_v4 = vpop.xlane.xlu1 %1260 }
 0x3b2   : > { %2205 = vpow2.f32 %v1285_v2  ;;  %v1287_v5 = vmul.f32 1.442695, %v1278_v3  ;;  %v1279_v6 = vsub.f32 %v1153_v27, %v1261_v4 }
 0x3b4   : > { %2207 = vpow2.f32 %v1287_v5  ;;  %v1289_v7 = vmul.f32 1.442695, %v1279_v6 }
 0x3b5   : > { %v1273_v8 = vpop.xlane.xlu0 %1272  ;;  %v1264_v9 = vpop.xlane.xlu1 %1263 }
 0x3b6   : > { %2209 = vpow2.f32 %v1289_v7  ;;  %v1280_v10 = vsub.f32 %v1156_v34, %v1264_v9  ;;  %v1283_v11 = vsub.f32 %v1247_v40, %v1273_v8  ;;  %v2199_v9 = vld [vmem:[%s2725_s4 + $0x10] sm:$0xff]  }
 0x3b8   : > { %v1291_v12 = vmul.f32 1.442695, %v1280_v10  ;;  %v1297_v17 = vmul.f32 1.442695, %v1283_v11 }
 0x3b9   : > { %v1267_v13 = vpop.xlane.xlu1 %1266 }
 0x3ba   : > { %v1281_v14 = vsub.f32 %v1200_v45, %v1267_v13  ;;  %2211 = vpow2.f32 %v1291_v12 }
 0x3bc   : > { %v2206_v15 = vpop.eup %2205  ;;  %v1293_v18 = vmul.f32 1.442695, %v1281_v14 }
 0x3bd   : > { %v1270_v19 = vpop.xlane.xlu1 %1269  ;;  %v1301_v20 = vsel %vm1064_vm2, %v2206_v15, 0.0 }
 0x3be   : > { %v2208_v21 = vpop.eup %2207  ;;  %2213 = vpow2.f32 %v1293_v18  ;;  %v1282_v22 = vsub.f32 %v1203_v51, %v1270_v19  ;;  %1302 = vadd.xlane.f32.xlu0 %v1301_v20 }
 0x3bf   : > { %v1304_v23 = vsel %vm1064_vm2, %v2208_v21, 0.0  ;;  %2215 = vpow2.f32 %v1297_v17 }
 0x3c0   : > { %v2210_v24 = vpop.eup %2209  ;;  %v1295_v25 = vmul.f32 1.442695, %v1282_v22  ;;  %1305 = vadd.xlane.f32.xlu1 %v1304_v23 }
 0x3c1   : > { %v1276_v26 = vpop.xlane.xlu1 %1275  ;;  %v1307_v27 = vsel %vm1064_vm2, %v2210_v24, 0.0 }
 0x3c2   : > { %2217 = vpow2.f32 %v1295_v25  ;;  %v1284_v28 = vsub.f32 %v1250_v60, %v1276_v26  ;;  %1308 = vadd.xlane.f32.xlu0 %v1307_v27 }
 0x3c4   : > { %v1299_v29 = vmul.f32 1.442695, %v1284_v28  ;;  %v2212_v30 = vpop.eup %2211 }
 0x3c5   : > { %v1310_v31 = vsel %vm1064_vm2, %v2212_v30, 0.0 }
 0x3c6   : > { %2219 = vpow2.f32 %v1299_v29  ;;  %1311 = vadd.xlane.f32.xlu1 %v1310_v31 }
 0x3c8   : > { %v2214_v32 = vpop.eup %2213 }
 0x3c9   : > { %v1313_v33 = vsel %vm1064_vm2, %v2214_v32, 0.0  ;;  %v2216_v34 = vpop.eup %2215 }
 0x3ca   : > { %1314 = vadd.xlane.f32.xlu0 %v1313_v33  ;;  %v1319_v36 = vsel %vm1064_vm2, %v2216_v34, 0.0 }
 0x3cc   : > { %v2218_v35 = vpop.eup %2217 }
 0x3cd   : > { %v1316_v37 = vsel %vm1064_vm2, %v2218_v35, 0.0 }
 0x3ce   : > { %1320 = vadd.xlane.f32.xlu0 %v1319_v36  ;;  %1317 = vadd.xlane.f32.xlu1 %v1316_v37 }
 0x3d0   : > { %v2220_v38 = vpop.eup %2219 }
 0x3d1   : > { %v1322_v39 = vsel %vm1064_vm2, %v2220_v38, 0.0 }
 0x3d2   : > { %1323 = vadd.xlane.f32.xlu1 %v1322_v39 }
 0x44b   : > { %v1303_v40 = vpop.xlane.xlu0 %1302 }
 0x44c   : > { %2221 = vrcp.f32 %v1303_v40 }
 0x44d   : > { %v1306_v41 = vpop.xlane.xlu1 %1305 }
 0x44e   : > { %2223 = vrcp.f32 %v1306_v41 }
 0x44f   : > { %v1309_v42 = vpop.xlane.xlu0 %1308 }
 0x450   : > { %2225 = vrcp.f32 %v1309_v42 }
 0x453   : > { %v1312_v43 = vpop.xlane.xlu1 %1311 }
 0x454   : > { %2227 = vrcp.f32 %v1312_v43 }
 0x456   : > { %v2222_v44 = vpop.eup %2221 }
 0x457   : > { %v1315_v45 = vpop.xlane.xlu0 %1314  ;;  %v1333_v47 = vmul.f32 %v2222_v44, %v2206_v15  ;;  %v2200_v15 = vld [vmem:[%s2725_s4 + $0x18] sm:$0xff]  }
 0x458   : > { %v2224_v46 = vpop.eup %2223  ;;  %2229 = vrcp.f32 %v1315_v45 }
 0x459   : > { %v1334_v48 = vmul.f32 %v2224_v46, %v2208_v21 }
 0x45a   : > { %v2226_v54 = vpop.eup %2225 }
 0x45b   : > { %v1321_v49 = vpop.xlane.xlu0 %1320  ;;  %v1318_v50 = vpop.xlane.xlu1 %1317  ;;  %v1341_v51 = vpack.c.bf16 %v1334_v48, %v1333_v47  ;;  %v1335_v61 = vmul.f32 %v2226_v54, %v2210_v24 }
 0x45c   : > { %2231 = vrcp.f32 %v1318_v50 }
 0x45d   : > { %2082 = vmatmul.mubr.msk.bf16.vlgmr.msra.gmra.mrb[32].mxu0 %vm1064_vm2, %v1341_v51  ;;  %2233 = vrcp.f32 %v1321_v49 }
 0x45e   : > { %2092 = vmatpush3.bf16.msra.mxu0 %v997_v58  ;;  %2093 = vmatprep.mubr.msk.bf16.mxu0 %vm2302_vm1, %v2301_v16  ;;  %v2228_v55 = vpop.eup %2227 }
 0x45f   : > { %v1324_v60 = vpop.xlane.xlu1 %1323  ;;  %2103 = vmatprep.subr.bf16.mxu0 %v2301_v16  ;;  %v1336_v62 = vmul.f32 %v2228_v55, %v2212_v30 }
 0x460   : > { %2235 = vrcp.f32 %v1324_v60 }
 0x461   : > { %v1342_v63 = vpack.c.bf16 %v1336_v62, %v1335_v61 }
 0x462   : > { %v2230_v0 = vpop.eup %2229 }
 0x463   : > { %2088 = vmatmul.mubr.msk.bf16.vlgmr.msra.gmra.mrb[32].mxu1 %vm1064_vm2, %v1342_v63  ;;  %v1337_v58 = vmul.f32 %v2230_v0, %v2214_v32 }
 0x464   : > { %2098 = vmatpush3.bf16.msra.mxu1 %v998_v59  ;;  %2099 = vmatprep.mubr.msk.bf16.mxu1 %vm2302_vm1, %v2301_v16 }
 0x465   : > { %2109 = vmatprep.subr.bf16.mxu1 %v2301_v16 }
 0x466   : > { %v2232_v52 = vpop.eup %2231 }
 0x467   : > { %v2234_v56 = vpop.eup %2233  ;;  %v1338_v1 = vmul.f32 %v2232_v52, %v2218_v35 }
 0x468   : > { %v1339_v4 = vmul.f32 %v2234_v56, %v2216_v34 }
 0x469   : > { %v1343_v3 = vpack.c.bf16 %v1338_v1, %v1337_v58 }
 0x46a   : > { %v2236_v2 = vpop.eup %2235 }
 0x46b   : > { %v1340_v5 = vmul.f32 %v2236_v2, %v2220_v38  ;;  %2094 = vmatmul.mubr.msk.bf16.vlgmr.msra.gmra.mrb[36].mxu0 %vm1064_vm2, %v1343_v3 }
 0x46c   : > { %2105 = vmatprep.mubr.msk.bf16.mxu0 %vm2302_vm1, %v2301_v16  ;;  %2104 = vmatpush3.bf16.msra.mxu0 %v2197_v53 }
 0x46d   : > { %v1344_v6 = vpack.c.bf16 %v1340_v5, %v1339_v4  ;;  %2115 = vmatprep.subr.bf16.mxu0 %v2301_v16 }
 0x46f   : > { %2100 = vmatmul.mubr.msk.bf16.vlgmr.msra.gmra.mrb[36].mxu1 %vm1064_vm2, %v1344_v6 }
 0x470   : > { %2111 = vmatprep.mubr.msk.bf16.mxu1 %vm2302_vm1, %v2301_v16  ;;  %2110 = vmatpush3.bf16.msra.mxu1 %v2198_v57 }
 0x471   : > { %2121 = vmatprep.subr.bf16.mxu1 %v2301_v16 }
 0x530   : > { %v1382_v59 = vpop.f32.mrb[32].mxu0 }
 0x531   : > { %v2083_v7 = vpop.f32.mrb[33].mxu0 }
 0x532   : > { %v1385_v8 = vpop.f32.mrb[34].mxu0 }
 0x533   : > { %v1521_v10 = vpack.c.bf16 %v1385_v8, %v1382_v59  ;;  %v2084_v11 = vpop.f32.mrb[35].mxu0 }
 0x535   : > { %2106 = vmatmul.mubr.msk.bf16.vlgmr.msra.gmra.mrb[40].mxu0 %vm1064_vm2, %v1521_v10 }
 0x536   : > { %2116 = vmatpush3.bf16.msra.mxu0 %v2199_v9  ;;  %2117 = vmatprep.mubr.msk.bf16.mxu0 %vm2302_vm1, %v2301_v16  ;;  %v1426_v12 = vpop.f32.mrb[32].mxu1 }
 0x537   : > { %v2089_v13 = vpop.f32.mrb[33].mxu1 }
 0x538   : > { %v1429_v14 = vpop.f32.mrb[34].mxu1 }
 0x539   : > { %v1522_v17 = vpack.c.bf16 %v1429_v14, %v1426_v12  ;;  %v2090_v18 = vpop.f32.mrb[35].mxu1 }
 0x53b   : > { %2112 = vmatmul.mubr.msk.bf16.vlgmr.msra.gmra.mrb[40].mxu1 %vm1064_vm2, %v1522_v17 }
 0x53c   : > { %2122 = vmatpush3.bf16.msra.mxu1 %v2200_v15  ;;  %2123 = vmatprep.mubr.msk.bf16.mxu1 %vm2302_vm1, %v2301_v16 }
 0x53e   : > { %v1470_v19 = vpop.f32.mrb[36].mxu0 }
 0x53f   : > { %v2095_v20 = vpop.f32.mrb[37].mxu0 }
 0x540   : > { %v1473_v21 = vpop.f32.mrb[38].mxu0 }
 0x541   : > { %v1523_v22 = vpack.c.bf16 %v1473_v21, %v1470_v19  ;;  %v2096_v23 = vpop.f32.mrb[39].mxu0 }
 0x542   : > { %v1514_v24 = vpop.f32.mrb[36].mxu1 }
 0x543   : > { %v2101_v25 = vpop.f32.mrb[37].mxu1  ;;  %2118 = vmatmul.mubr.msk.bf16.vlgmr.msra.gmra.mrb[44].mxu0 %vm1064_vm2, %v1523_v22 }
 0x544   : > { %v1517_v26 = vpop.f32.mrb[38].mxu1 }
 0x545   : > { %v1524_v27 = vpack.c.bf16 %v1517_v26, %v1514_v24  ;;  %v2102_v28 = vpop.f32.mrb[39].mxu1 }
 0x547   : > { %2124 = vmatmul.mubr.msk.bf16.vlgmr.msra.gmra.mrb[44].mxu1 %vm1064_vm2, %v1524_v27 }
 0x608   : > { %v1576_v29 = vpop.f32.mrb[40].mxu0 }
 0x609   : > { %v2107_v30 = vpop.f32.mrb[41].mxu0  ;;  %v1733_v33 = vsel %vm253_vm0, %v1576_v29, 0.0 }
 0x60a   : > { %v1579_v31 = vpop.f32.mrb[42].mxu0 }
 0x60b   : > { %v2108_v32 = vpop.f32.mrb[43].mxu0  ;;  %v1740_v38 = vsel %vm253_vm0, %v1579_v31, 0.0 }
 0x60e   : > { %v1626_v16 = vpop.f32.mrb[40].mxu1 }
 0x60f   : > { %v1734_v34 = vsel %vm253_vm0, %v1626_v16, 0.0  ;;  %v2113_v35 = vpop.f32.mrb[41].mxu1 }
 0x610   : > { %v1735_v36 = vadd.f32 %v1734_v34, %v1733_v33  ;;  %v1629_v37 = vpop.f32.mrb[42].mxu1 }
 0x611   : > { %v1741_v39 = vsel %vm253_vm0, %v1629_v37, 0.0  ;;  %v2114_v40 = vpop.f32.mrb[43].mxu1 }
 0x612   : > { %v1742_v41 = vadd.f32 %v1741_v39, %v1740_v38 }
 0x616   : > { %v1676_v42 = vpop.f32.mrb[44].mxu0 }
 0x617   : > { %v1736_v43 = vsel %vm253_vm0, %v1676_v42, 0.0  ;;  %v2119_v44 = vpop.f32.mrb[45].mxu0 }
 0x618   : > { %v1737_v45 = vadd.f32 %v1736_v43, %v1735_v36  ;;  %v1679_v46 = vpop.f32.mrb[46].mxu0 }
 0x619   : > { %v1743_v47 = vsel %vm253_vm0, %v1679_v46, 0.0  ;;  %v2120_v48 = vpop.f32.mrb[47].mxu0 }
 0x61a   : > { %v1726_v49 = vpop.f32.mrb[44].mxu1  ;;  %v1744_v50 = vadd.f32 %v1743_v47, %v1742_v41 }
 0x61b   : > { %v1738_v51 = vsel %vm253_vm0, %v1726_v49, 0.0  ;;  %v2125_v54 = vpop.f32.mrb[45].mxu1 }
 0x61c   : > { %v1739_v55 = vadd.f32 %v1738_v51, %v1737_v45  ;;  %v1729_v60 = vpop.f32.mrb[46].mxu1 }
 0x61d   : > { %v1745_v61 = vsel %vm253_vm0, %v1729_v60, 0.0  ;;  %v2126_v62 = vpop.f32.mrb[47].mxu1 }
 0x61e   : > { %1747 = vst.msk [vmem:[%s244_s9] sm:$0xff] %vm253_vm0, %v1739_v55  ;;  %v1746_v63 = vadd.f32 %v1745_v61, %v1744_v50 }
 0x620   : > { %1748 = vst.msk [vmem:[%s244_s9 + $0x8] sm:$0xff] %vm253_vm0, %v1746_v63 }
 0x621   : > { %2250 = shalt.err (!%p2247_p3)
}
 0x622   : > { %s2251_s19 = scalar_lea.hbm %s2677_s14, 256  ;;  %s2255_s28 = scalar_lea.hbm %s2727_s6, 512 }
 0x623   : > { %p2252_p4 = scmp.ne.s32.totalorder %s2677_s14, %s2251_s19  ;;  %p2256_p9 = scmp.lt.u32.totalorder %s2677_s14, %s2727_s6 }
 0x624   : > { %p2257_p10 = scmp.lt.u32.totalorder %s2255_s28, %s2251_s19  ;;  %p2259_p12 = scmp.lt.u32.totalorder %s2251_s19, %s2677_s14 }
 0x625   : > { %p2253_p7 = pnand %p2252_p4, %p2380_p5 }
 0x626   : > { %p2258_p11 = por %p2257_p10, %p2256_p9 }
 0x627   : > { %p2254_p8 = pneg %p2253_p7 }
 0x628   : > { %p2260_p13 = por %p2259_p12, %p2258_p11 }
 0x62a   : > { %p2261_p0 = pnand %p2260_p13, %p2254_p8 }
 0x62c   : > { %2264 = shalt.err (!%p2261_p0)
}
 0x62d   : > { %s2305_s11 = smov 128   ;;  %s2306_s12 = smov 8  }
 0x62e   : > { %2127 = dma.vmem_to_hbm [thread:$0]  (%p2380_p5), %s2670_s10, 256, %s2677_s14, %s2680_s25, %s2305_s11, %s2305_s11, %s2306_s12  }
 0x62f PF: > { %p2133_p1 = scmp.ge.s32.totalorder %s2299_s24, 2  ;;  %s1778_s13 = sand.u32 1, %s2287_s21  }
 0x630   : > { %s1779_s15 = scalar_lea.sflag [#allocation3], %s1778_s13 }
 0x631   : > { %p2130_p2 = pnand %p2133_p1, %p2384_p6 }
 0x633   : > { %2282 = dma.done.wait (!%p2130_p2), %s1779_s15, 256  }
 0x634   : > { %2284 = vsyncadd (!%p2130_p2), %s1779_s15, 4294967040  ;;  %p16_p3 = scmp.ge.s32.totalorder %s2367_s27, 4   ;;  %s2730_s21 = smov %s2291_s22 }
 0x635   : > { %s2731_s22 = smov %s2295_s23  ;;  %s2732_s23 = smov %s2378_s30 }
 0x636   : > { %s2733_s24 = smov %s2367_s27  ;;  %18 = sbr.rel (!%p16_p3) target bundleno = 3 (0x3), region = 79 }
 0x63d   :  { %1784 = vsyncpa [#allocation3], 1 }
 0x63e   :  { %1786 = vsyncpa [#allocation3 + $0x1], 1 }

</bundles_post_ra>
